<compile_context>
chip_gen: v7x
topology: tpu7x:2x2x1
jax: 0.10.0
libtpu: 0.0.40
codegen_flags: <defaults>
</compile_context>

<pallas_src>
import functools

import jax
import jax.numpy as jnp
from jax.experimental import pallas as pl
from jax.experimental.pallas import tpu as pltpu


def _pool_kernel(x_ref, o_ref, *, pool_k, do_mean, do_max, inv_k, fused):
    """One output tile per grid step; the window reduction stays in vregs."""
    if fused:
        # x_ref: (TC, TL*K) contiguous slab straight from the (B, C, L) layout.
        # Cast once to f32 so the strided de-interleave always runs on 32-bit
        # lanes, then peel window element k with a static lane-strided slice.
        x = x_ref[...].astype(jnp.float32)

        def window(k):
            return x[:, k::pool_k]                        # (TC, TL)
    else:
        # x_ref: (K, TC, TL) -- window element k is a contiguous slab.
        def window(k):
            return x_ref[k].astype(jnp.float32)           # (TC, TL)

    v = window(0)
    s = v
    m = v
    for k in range(1, pool_k):                            # static unroll, K small
        v = window(k)
        if do_mean:
            s = s + v
        if do_max:
            m = jnp.maximum(m, v)

    slot = 0
    if do_mean:
        # count_include_pad=False with padding=0 -> plain 1/K average.
        o_ref[slot] = (s * inv_k).astype(o_ref.dtype)
        slot += 1
    if do_max:
        o_ref[slot] = m.astype(o_ref.dtype)


def _vmem_limit_bytes():
    try:
        cap = int(pltpu.get_tpu_info().vmem_capacity_bytes)
    except Exception:
        cap = 64 * 1024 * 1024
    # 64-MiB parts (v7x): ~48 MiB; 128-MiB parts (v5e/v6e): up to 96 MiB.
    return int(min(96 * 1024 * 1024, (cap * 3) // 4))


def _pooling_pallas(x, pool_k, do_mean, do_max, fused):
    """x: (B, C, Lout*K) -> (B, n_out, C, Lout)."""
    B, C, L = x.shape
    Lout = L // pool_k
    n_out = int(do_mean) + int(do_max)
    dt = x.dtype
    isz = jnp.dtype(dt).itemsize

    # Channel tile: 256 is a multiple of the sublane packing unit for every
    # dtype (8 x f32, 16 x bf16, 32 x int8); small C uses the full dim
    # (exempt from the (8,128) rule).
    cap_c = 256
    tc = C if C <= cap_c else cap_c

    # Lane tile: target ~6 MiB per input block (amortizes the ~0.35 us
    # per-grid-step overhead), multiple of 128, at most 4096 outputs.
    target_in_bytes = 6 * 1024 * 1024
    cap_l = (target_in_bytes // max(1, tc * pool_k * isz)) // 128 * 128
    cap_l = max(128, min(4096, cap_l))
    tl = Lout if Lout <= cap_l else cap_l

    # Ragged edge tiles (C % tc != 0 or Lout % tl != 0) are handled by the
    # cdiv grid: out-of-range lanes/sublanes only feed masked output stores.
    grid = (B, pl.cdiv(C, tc), pl.cdiv(Lout, tl))

    if fused:
        inputs = (x,)
        in_specs = [pl.BlockSpec((None, tc, tl * pool_k),
                                 lambda b, c, l: (b, c, l))]
    else:
        # Fallback: one extra HBM pass so that each window element becomes a
        # contiguous (TC, TL) slab the kernel can index with x_ref[k].
        # TODO(synk): drop once lane-strided value slices lower everywhere.
        xw = x.reshape(B, C, Lout, pool_k).transpose(0, 3, 1, 2)
        inputs = (xw,)
        in_specs = [pl.BlockSpec((None, pool_k, tc, tl),
                                 lambda b, c, l: (b, 0, c, l))]

    # Stacked output (mean first, then max); the wrapper reshape to
    # (B, n_out*C, Lout) is metadata-only, replacing jnp.concatenate.
    # TODO(synk): when Lout < 128 the output stores are masked (vst.msk);
    # a lane-dense re-layout (C on lanes) would help very short sequences.
    out_shape = jax.ShapeDtypeStruct((B, n_out, C, Lout), dt)
    out_specs = pl.BlockSpec((None, n_out, tc, tl),
                             lambda b, c, l: (b, 0, c, l))

    kernel = functools.partial(_pool_kernel, pool_k=pool_k, do_mean=do_mean,
                               do_max=do_max, inv_k=1.0 / pool_k, fused=fused)

    return pl.pallas_call(
        kernel,
        out_shape=out_shape,
        grid=grid,
        in_specs=in_specs,
        out_specs=out_specs,
        compiler_params=pltpu.CompilerParams(
            dimension_semantics=("parallel", "parallel", "parallel"),
            vmem_limit_bytes=_vmem_limit_bytes(),
        ),
    )(*inputs)


_FUSED_OK = {}


def _fused_supported(pool_k):
    """Feature-detect in-kernel lane-strided window extraction for this K."""
    if pool_k not in _FUSED_OK:
        try:
            probe = jax.random.uniform(jax.random.PRNGKey(1),
                                       (1, 8, 128 * pool_k), jnp.float32)
            got = _pooling_pallas(probe, pool_k, True, True, fused=True)
            jax.block_until_ready(got)
            win = probe.reshape(1, 8, 128, pool_k)
            want = jnp.stack([win.mean(-1), win.max(-1)], axis=1)
            _FUSED_OK[pool_k] = bool(jnp.allclose(got, want,
                                                  atol=1e-5, rtol=1e-5))
        except Exception:
            _FUSED_OK[pool_k] = False
    return _FUSED_OK[pool_k]


def pooling_layer_forward(barray, *, max_pooling, mean_pooling=False,
                          conv_pooling=False, pooling_size=None, stride=None,
                          padding=0):
    """Pallas equivalent of pooling_layer.forward(barray) for (B, C, L) inputs."""
    if not (max_pooling or mean_pooling):
        if conv_pooling:
            # TODO(synk): conv_pooling uses nn.Conv1d with an undefined `insize`
            # in the original module (no weights provided); not implemented.
            raise NotImplementedError("conv_pooling is not supported")
        raise ValueError("need at least one of max_pooling / mean_pooling")

    K = int(pooling_size)
    if stride is None:
        stride = K
    if padding != 0 or stride != K:
        # TODO(synk): overlapping / padded windows need strided window gathers;
        # only the module default (stride == pooling_size, padding == 0).
        raise NotImplementedError("only padding=0 and stride == pooling_size")

    B, C, L = barray.shape
    Lout = L // K
    if Lout == 0:
        raise ValueError("pooling_size larger than the sequence length")
    if L != Lout * K:
        # PyTorch {Avg,Max}Pool1d with ceil_mode=False drop the remainder.
        barray = barray[:, :, :Lout * K]

    fused = _fused_supported(K)
    out = _pooling_pallas(barray, K, bool(mean_pooling), bool(max_pooling),
                          fused)
    # (B, n_out, C, Lout) -> (B, n_out*C, Lout): metadata-only merge that
    # matches torch.cat((avg, max), dim=-2) when both poolings are enabled.
    n_out = out.shape[1]
    return out.reshape(B, n_out * C, Lout)


def _reference(barray, *, max_pooling, mean_pooling, pooling_size, stride=None,
               padding=0):
    """Pure-JAX reference of the PyTorch forward (padding=0, stride=K)."""
    if stride is None:
        stride = pooling_size
    B, C, L = barray.shape
    Lout = (L + 2 * padding - pooling_size) // stride + 1
    idx = jnp.arange(Lout)[:, None] * stride + jnp.arange(pooling_size)[None, :]
    win = barray[:, :, idx]                       # (B, C, Lout, K)
    avg = jnp.mean(win, axis=-1)
    mx = jnp.max(win, axis=-1)
    if mean_pooling and max_pooling:
        return jnp.concatenate([avg, mx], axis=-2)
    if max_pooling:
        return mx
    return avg


if __name__ == "__main__":
    key = jax.random.PRNGKey(0)
    B, C, L, K = 2, 8, 64, 4
    k0, k1 = jax.random.split(key)
    barray = jax.random.normal(k0, (B, C, L), dtype=jnp.float32)

    # mean+max branch: torch.cat((AvgPool1d(x), MaxPool1d(x)), dim=-2)
    out_both = pooling_layer_forward(barray, max_pooling=True,
                                     mean_pooling=True, pooling_size=K)
    jax.block_until_ready(out_both)
    ref_both = _reference(barray, max_pooling=True, mean_pooling=True,
                          pooling_size=K)
    assert out_both.shape == (B, 2 * C, L // K)
    assert jnp.allclose(out_both, ref_both, atol=1e-5, rtol=1e-5)

    # max-only branch
    out_max = pooling_layer_forward(barray, max_pooling=True, pooling_size=K)
    ref_max = _reference(barray, max_pooling=True, mean_pooling=False,
                         pooling_size=K)
    assert jnp.allclose(out_max, ref_max, atol=1e-5, rtol=1e-5)

    # mean-only branch
    out_mean = pooling_layer_forward(barray, max_pooling=False,
                                     mean_pooling=True, pooling_size=K)
    ref_mean = _reference(barray, max_pooling=False, mean_pooling=True,
                          pooling_size=K)
    assert jnp.allclose(out_mean, ref_mean, atol=1e-5, rtol=1e-5)

    # trailing remainder is dropped, matching PyTorch ceil_mode=False
    barray_odd = jax.random.normal(k1, (B, C, L + 2), dtype=jnp.float32)
    out_odd = pooling_layer_forward(barray_odd, max_pooling=True,
                                    mean_pooling=True, pooling_size=K)
    ref_odd = _reference(barray_odd, max_pooling=True, mean_pooling=True,
                         pooling_size=K)
    assert out_odd.shape == ref_odd.shape == (B, 2 * C, (L + 2) // K)
    assert jnp.allclose(out_odd, ref_odd, atol=1e-5, rtol=1e-5)

    print("KERNEL_OK")
</pallas_src>

<mosaic_0001>
module attributes {stable_mosaic.version = 11 : i64} {
  func.func @_pool_kernel(%arg0: i32, %arg1: i32, %arg2: i32, %arg3: memref<1x4x8x16xf32, #tpu.memory_space<vmem>>, %arg4: memref<1x2x8x16xf32, #tpu.memory_space<vmem>>) attributes {dimension_semantics = [#tpu.dimension_semantics<parallel>, #tpu.dimension_semantics<parallel>, #tpu.dimension_semantics<parallel>], iteration_bounds = array<i64: 2, 1, 1>, scalar_prefetch = 0 : i64, scratch_operands = 0 : i64, tpu.core_type = #tpu.core_type<tc>, window_params = [{transform_indices = @transform_0, window_bounds = array<i64: 1, 4, 8, 16>}, {transform_indices = @transform_1, window_bounds = array<i64: 1, 2, 8, 16>}]} {
    %c0 = arith.constant 0 : index
    %c0_0 = arith.constant 0 : index
    %c0_1 = arith.constant 0 : index
    %c0_2 = arith.constant 0 : index
    %0 = vector.load %arg3[%c0, %c0_0, %c0_1, %c0_2] : memref<1x4x8x16xf32, #tpu.memory_space<vmem>>, vector<1x1x8x16xf32>
    %1 = vector.shape_cast %0 : vector<1x1x8x16xf32> to vector<8x16xf32>
    %c0_3 = arith.constant 0 : index
    %c1 = arith.constant 1 : index
    %c0_4 = arith.constant 0 : index
    %c0_5 = arith.constant 0 : index
    %2 = vector.load %arg3[%c0_3, %c1, %c0_4, %c0_5] : memref<1x4x8x16xf32, #tpu.memory_space<vmem>>, vector<1x1x8x16xf32>
    %3 = vector.shape_cast %2 : vector<1x1x8x16xf32> to vector<8x16xf32>
    %4 = arith.addf %1, %3 : vector<8x16xf32>
    %5 = arith.maximumf %1, %3 : vector<8x16xf32>
    %c0_6 = arith.constant 0 : index
    %c2 = arith.constant 2 : index
    %c0_7 = arith.constant 0 : index
    %c0_8 = arith.constant 0 : index
    %6 = vector.load %arg3[%c0_6, %c2, %c0_7, %c0_8] : memref<1x4x8x16xf32, #tpu.memory_space<vmem>>, vector<1x1x8x16xf32>
    %7 = vector.shape_cast %6 : vector<1x1x8x16xf32> to vector<8x16xf32>
    %8 = arith.addf %4, %7 : vector<8x16xf32>
    %9 = arith.maximumf %5, %7 : vector<8x16xf32>
    %c0_9 = arith.constant 0 : index
    %c3 = arith.constant 3 : index
    %c0_10 = arith.constant 0 : index
    %c0_11 = arith.constant 0 : index
    %10 = vector.load %arg3[%c0_9, %c3, %c0_10, %c0_11] : memref<1x4x8x16xf32, #tpu.memory_space<vmem>>, vector<1x1x8x16xf32>
    %11 = vector.shape_cast %10 : vector<1x1x8x16xf32> to vector<8x16xf32>
    %12 = arith.addf %8, %11 : vector<8x16xf32>
    %13 = arith.maximumf %9, %11 : vector<8x16xf32>
    %cst = arith.constant 2.500000e-01 : f32
    %14 = vector.broadcast %cst : f32 to vector<8x16xf32>
    %15 = arith.mulf %12, %14 : vector<8x16xf32>
    %c0_12 = arith.constant 0 : index
    %c0_13 = arith.constant 0 : index
    %c0_14 = arith.constant 0 : index
    %c0_15 = arith.constant 0 : index
    %16 = vector.load %arg4[%c0_12, %c0_13, %c0_14, %c0_15] : memref<1x2x8x16xf32, #tpu.memory_space<vmem>>, vector<1x1x8x16xf32>
    %17 = vector.shape_cast %16 : vector<1x1x8x16xf32> to vector<8x16xf32>
    %18 = vector.shape_cast %15 : vector<8x16xf32> to vector<1x1x8x16xf32>
    tpu.vector_store %arg4[%c0_12, %c0_13, %c0_14, %c0_15], %18 {strides = array<i32>} : memref<1x2x8x16xf32, #tpu.memory_space<vmem>>, vector<1x1x8x16xf32>,
    %c0_16 = arith.constant 0 : index
    %c1_17 = arith.constant 1 : index
    %c0_18 = arith.constant 0 : index
    %c0_19 = arith.constant 0 : index
    %19 = vector.load %arg4[%c0_16, %c1_17, %c0_18, %c0_19] : memref<1x2x8x16xf32, #tpu.memory_space<vmem>>, vector<1x1x8x16xf32>
    %20 = vector.shape_cast %19 : vector<1x1x8x16xf32> to vector<8x16xf32>
    %21 = vector.shape_cast %13 : vector<8x16xf32> to vector<1x1x8x16xf32>
    tpu.vector_store %arg4[%c0_16, %c1_17, %c0_18, %c0_19], %21 {strides = array<i32>} : memref<1x2x8x16xf32, #tpu.memory_space<vmem>>, vector<1x1x8x16xf32>,
    return
  }
  func.func @transform_0(%arg0: i32, %arg1: i32, %arg2: i32) -> (i32, i32, i32, i32) {
    %c0_i32 = arith.constant 0 : i32
    %c0_i32_0 = arith.constant 0 : i32
    return %arg0, %c0_i32, %arg1, %arg2 : i32, i32, i32, i32
  }
  func.func @transform_1(%arg0: i32, %arg1: i32, %arg2: i32) -> (i32, i32, i32, i32) {
    %c0_i32 = arith.constant 0 : i32
    %c0_i32_0 = arith.constant 0 : i32
    return %arg0, %c0_i32, %arg1, %arg2 : i32, i32, i32, i32
  }
}

</mosaic_0001>

<bundles_post_ra>
// kernel: tpu_custom_call.1
= control target key start
LH: loop header
LB: loop body
LE: loop exit
PB: predicated region body
PF: predicated region fallthrough
CT: control target
= control target key end

     0   :  { %6 = vsyncpa [#allocation3], 0  ;;  %s681_s0 = inlined_call_operand.hbm [shape: f32[2,4,8,16], index: 0, kind: input, shape index: {}]   ;;  %s682_s1 = inlined_call_operand.hbm [shape: f32[2,2,8,16], index: 1, kind: output, shape index: {}]  }
   0x1   :  { %8 = vsyncpa [#allocation3 + $0x1], 0 }
   0x2   :  { %9 = vsyncpa [#allocation4], 0 }
   0x3   :  { %11 = vsyncpa [#allocation4 + $0x1], 0  ;;  %s505_s6 = smov 0   ;;  %s507_s7 = smov 0  }
   0x4   :  { %s509_s8 = smov 0   ;;  %s511_s9 = smov 0  }
   0x5   :  { %s513_s10 = smov 0   ;;  %s515_s11 = smov 0  }
   0x6 LB: > { %s288_s12 = sadd.s32 4294967295, %s487_s11   ;;  %s289_s13 = sadd.s32 4294967294, %s487_s11   ;;  %s487_s11 = sphi %s515_s11, %s17_s11   ;;  %s483_s10 = sphi %s513_s10, %s697_s10   ;;  %s479_s9 = sphi %s511_s9, %s696_s9   ;;  %s475_s8 = sphi %s509_s8, %s695_s8   ;;  %s471_s7 = sphi %s507_s7, %s694_s7   ;;  %s467_s6 = sphi %s505_s6, %s693_s6  }
   0x7   : > { %s36_s14 = sadd.s32 1, %s483_s10  ;;  %s47_s15 = sadd.s32 1, %s475_s8 }
   0x8   : > { %p38_p0 = scmp.ge.s32.totalorder %s36_s14, 2  ;;  %p54_p1 = scmp.ne.s32.totalorder %s475_s8, %s471_s7 }
   0x9   : > { %p55_p2 = scmp.eq.s32.totalorder %s487_s11, 0  ;;  %p60_p3 = scmp.ne.s32.totalorder %s471_s7, %s467_s6 }
   0xa   : > { %s699_s14 = smov (%p38_p0, %s36_s14), 0  ;;  %p61_p5 = scmp.eq.s32.totalorder %s288_s12, 0 }
   0xb   : > { %p546_p4 = por %p55_p2, %p54_p1  ;;  %s40_s17 = ssub.s32 %s483_s10, %s699_s14 }
   0xc   : > { %p88_p6 = scmp.eq.s32.totalorder %s288_s12, 1  ;;  %p45_p7 = scmp.eq.s32.totalorder %s40_s17, 0 }
   0xd   : > { %p552_p8 = por %p61_p5, %p60_p3  ;;  %p94_p10 = scmp.eq.s32.totalorder %s289_s13, 1 }
   0xe   : > { %p556_p9 = por %p88_p6, %p54_p1  ;;  %p321_p13 = scmp.lt.s32.totalorder %s487_s11, 2 }
   0xf   : > { %s561_s20 = scalar_select %p45_p7, %s475_s8, %s47_s15  }
  0x10   : > { %s686_s19 = scalar_select %p556_p9, 1, 0 }
  0x11   : > { %p563_p11 = por %p94_p10, %p60_p3  ;;  %s114_s22 = sand.u32 1, %s475_s8  }
  0x12   : > { %s292_s23 = sshll.u32 %s114_s22, 5  ;;  %s307_s24 = sshll.u32 %s483_s10, 9 }
  0x13   : > { %s687_s21 = scalar_select %p563_p11, 1, 0 }
  0x14   : > { %s574_s27 = scalar_lea.hbm %s681_s0, %s307_s24  ;;  %s118_s28 = scalar_lea.vmem [#allocation2], %s292_s23 }
  0x15   : > { %s127_s29 = sshll.u32 %s118_s28, 4  ;;  %p580_p0 = pnand %p321_p13, %p546_p4  ;;  %s576_s29 = int_to_ptr.vmem [resolvable:$true] %s127_s29 }
  0x16   : > { %s585_s2 = scalar_lea.sflag [#allocation3], %s114_s22  ;;  %s375_s3 = scalar_lea.hbm %s574_s27, 512 }
  0x17   : > { %p376_p2 = scmp.ne.s32.totalorder %s574_s27, %s375_s3  ;;  %p377_p3 = pneg %p580_p0 }
  0x18   : > { %s380_s12 = scalar_lea.hbm %s681_s0, 1024  ;;  %p381_p4 = scmp.lt.u32.totalorder %s574_s27, %s681_s0 }
  0x19   : > { %p378_p5 = pnand %p377_p3, %p376_p2  ;;  %p382_p7 = scmp.lt.u32.totalorder %s380_s12, %s375_s3 }
  0x1a   : > { %p384_p13 = scmp.lt.u32.totalorder %s375_s3, %s574_s27 }
  0x1b   : > { %p379_p6 = pneg %p378_p5  ;;  %p383_p10 = por %p382_p7, %p381_p4 }
  0x1d   : > { %p385_p12 = por %p384_p13, %p383_p10 }
  0x1f   : > { %p386_p1 = pnand %p385_p12, %p379_p6 }
  0x21   : > { %389 = shalt.err (!%p386_p1)
}
  0x22   : > { %s390_s16 = scalar_lea.vmem %s576_s29, 512  ;;  %s489_s17 = smov [#allocation2]  }
  0x23   : > { %p391_p2 = scmp.ne.s32.totalorder %s576_s29, %s390_s16  ;;  %s395_s22 = sshll.u32 %s489_s17, 4  ;;  %s396_s22 = int_to_ptr.vmem [resolvable:$false] %s395_s22 }
  0x24   : > { %s397_s23 = scalar_lea.vmem %s396_s22, 1024  ;;  %p398_p9 = scmp.lt.s32.totalorder %s576_s29, %s396_s22 }
  0x25   : > { %p393_p5 = pnand %p391_p2, %p377_p3  ;;  %p399_p4 = scmp.lt.s32.totalorder %s397_s23, %s390_s16 }
  0x27   : > { %p394_p11 = pneg %p393_p5  ;;  %p400_p7 = por %p399_p4, %p398_p9 }
  0x29   : > { %p401_p10 = pnand %p400_p7, %p394_p11 }
  0x2b   : > { %404 = shalt.err (!%p401_p10)
}
  0x2c   : > { %s490_s24 = smov 128   ;;  %s491_s25 = smov 8  }
  0x2d   : > { %316 = dma.hbm_to_vmem [thread:$0]  (!%p580_p0), %s574_s27, 512, %s576_s29, %s585_s2, %s490_s24, %s490_s24, %s491_s25  }
  0x2e   : > { %p135_p12 = scmp.lt.s32.totalorder %s487_s11, 3  ;;  %p689_p1 = scmp.ge.s32.totalorder %s487_s11, 1 }
  0x30   : > { %p136_p3 = pnand %p689_p1, %p135_p12 }
  0x31   : > { %s617_s26 = sand.u32 (!%p136_p3), 1, %s471_s7  }
  0x32   : > { %139 = sbr.rel (%p136_p3) target bundleno = 85 (0x55), region = 24  ;;  %s296_s28 = sshll.u32 (!%p136_p3), %s617_s26, 5 }
  0x33   : > { %s142_s3 = scalar_lea.sflag (!%p136_p3), [#allocation3], %s617_s26  ;;  %s145_s4 = scalar_lea.vmem (!%p136_p3), [#allocation2], %s296_s28 }
  0x39   : > { %458 = dma.done.wait (%p552_p8), %s142_s3, 512  }
  0x3a   : > { %460 = vsyncadd (%p552_p8), %s142_s3, 4294966784  ;;  %s297_s27 = sshll.u32 %s617_s26, 4  ;;  %v164_v0 = vld [vmem:[%s145_s4] sm:$0xff]  ;;  %v298_v1 = vld [vmem:[%s145_s4 + $0x8] sm:$0xff]  ;;  %s308_s2 = sshll.u32 %s479_s9, 8  ;;  %vm178_vm0 = vcmask 130048  }
  0x3b   : > { %v299_v2 = vld [vmem:[%s145_s4 + $0x10] sm:$0xff]  ;;  %v167_v3 = vadd.f32 %v298_v1, %v164_v0  ;;  %v168_v4 = vmax.f32 %v164_v0, %v298_v1  ;;  %v300_v5 = vld [vmem:[%s145_s4 + $0x18] sm:$0xff]  ;;  %s163_s29 = scalar_lea.vmem [#allocation5], %s297_s27  ;;  %s632_s12 = scalar_lea.hbm %s682_s1, %s308_s2 }
  0x3c   : > { %s198_s30 = sshll.u32 %s163_s29, 4  ;;  %s183_s13 = scalar_lea.sflag [#allocation4], %s617_s26  ;;  %s627_s30 = int_to_ptr.vmem [resolvable:$true] %s198_s30 }
  0x3d   : > { %v171_v6 = vadd.f32 %v299_v2, %v167_v3  ;;  %v172_v7 = vmax.f32 %v168_v4, %v299_v2  ;;  %s405_s15 = scalar_lea.vmem %s627_s30, 256  ;;  %p690_p9 = scmp.ne.s32.totalorder %s686_s19, 0 }
  0x3e   : > { %p406_p8 = scmp.ne.s32.totalorder %s627_s30, %s405_s15  ;;  %s492_s9 = smov [#allocation5]  }
  0x3f   : > { %v175_v8 = vadd.f32 %v300_v5, %v171_v6  ;;  %v176_v9 = vmax.f32 %v172_v7, %v300_v5  ;;  %s409_s16 = sshll.u32 %s492_s9, 4  ;;  %s410_s16 = int_to_ptr.vmem [resolvable:$false] %s409_s16 }
  0x40   : > { %p407_p11 = pnand %p406_p8, %p690_p9  ;;  %s411_s17 = scalar_lea.vmem %s410_s16, 512 }
  0x41   : > { %v177_v10 = vmul.f32 0.25, %v175_v8  ;;  %301 = vst.msk [vmem:[%s163_s29 + $0x8] sm:$0xff] %vm178_vm0, %v176_v9  ;;  %p412_p6 = scmp.lt.s32.totalorder %s627_s30, %s410_s16  ;;  %p413_p13 = scmp.lt.s32.totalorder %s411_s17, %s405_s15 }
  0x42   : > { %p408_p0 = pneg %p407_p11 }
  0x43   : > { %179 = vst.msk [vmem:[%s163_s29] sm:$0xff] %vm178_vm0, %v177_v10  ;;  %p414_p2 = por %p413_p13, %p412_p6 }
  0x45   : > { %p415_p5 = pnand %p414_p2, %p408_p0 }
  0x47   : > { %418 = shalt.err (!%p415_p5)
}
  0x48   : > { %s419_s22 = scalar_lea.hbm %s632_s12, 256  ;;  %s423_s25 = scalar_lea.hbm %s682_s1, 512 }
  0x49   : > { %p420_p4 = scmp.ne.s32.totalorder %s632_s12, %s419_s22  ;;  %p424_p12 = scmp.lt.u32.totalorder %s632_s12, %s682_s1 }
  0x4a   : > { %p425_p1 = scmp.lt.u32.totalorder %s423_s25, %s419_s22  ;;  %p427_p8 = scmp.lt.u32.totalorder %s419_s22, %s632_s12 }
  0x4b   : > { %p421_p7 = pnand %p420_p4, %p690_p9 }
  0x4c   : > { %p426_p3 = por %p425_p1, %p424_p12 }
  0x4d   : > { %p422_p10 = pneg %p421_p7 }
  0x4e   : > { %p428_p11 = por %p427_p8, %p426_p3 }
  0x50   : > { %p429_p0 = pnand %p428_p11, %p422_p10 }
  0x52   : > { %432 = shalt.err (!%p429_p0)
}
  0x53   : > { %s493_s4 = smov 128   ;;  %s494_s27 = smov 8  }
  0x54   : > { %311 = dma.vmem_to_hbm [thread:$0]  (%p690_p9), %s627_s30, 256, %s632_s12, %s183_s13, %s493_s4, %s493_s4, %s494_s27  }
  0x55 PF: > { %s213_s29 = sand.u32 1, %s467_s6   ;;  %p691_p6 = scmp.ne.s32.totalorder %s687_s21, 0 }
  0x56   : > { %p692_p13 = scmp.ge.s32.totalorder %s487_s11, 2  ;;  %s214_s2 = scalar_lea.sflag [#allocation4], %s213_s29 }
  0x58   : > { %p318_p2 = pnand %p692_p13, %p691_p6 }
  0x5a   : > { %462 = dma.done.wait (!%p318_p2), %s214_s2, 256  }
  0x5b   : > { %464 = vsyncadd (!%p318_p2), %s214_s2, 4294967040  ;;  %s17_s11 = sadd.s32 1, %s487_s11   ;;  %s693_s6 = smov %s471_s7 }
  0x5c   : > { %p14_p5 = scmp.ge.s32.totalorder %s17_s11, 4   ;;  %s694_s7 = smov %s475_s8 }
  0x5d   : > { %s695_s8 = smov %s561_s20  ;;  %s696_s9 = smov %s483_s10 }
  0x5e   : > { %s697_s10 = smov %s699_s14  ;;  %16 = sbr.rel (!%p14_p5) target bundleno = 6 (0x6), region = 73 }
  0x65   :  { %219 = vsyncpa [#allocation3], 1 }
  0x66   :  { %221 = vsyncpa [#allocation3 + $0x1], 1 }
  0x67   :  { %222 = vsyncpa [#allocation4], 1 }
  0x68   :  { %224 = vsyncpa [#allocation4 + $0x1], 1 }

</bundles_post_ra>
